<compile_context>
chip_gen: v5e
topology: v5e:2x2
jax: 0.10.0
libtpu: 0.0.40
codegen_flags: <defaults>
</compile_context>

<pallas_src>
import math
from collections import namedtuple

import jax
import jax.numpy as jnp
import numpy as np
from jax.experimental import pallas as pl
from jax.experimental.pallas import tpu as pltpu

SoftCopyAttentionOutput = namedtuple(
    "SoftCopyAttentionOutput", ["weights", "context", "logits", "orig_logits", "boost"])


def _soft_copy_attention_kernel(cells_ref, mask_ref, query_ref, align_ref, align_mask_ref,
                                copy_src_ref, wh_ref, ws_ref, vt_ref,
                                weights_ref, context_ref, logits_ref, orig_logits_ref, boost_ref):
    cells = cells_ref[...]                                   # (TB, N, D)  f32 or bf16
    maskf = mask_ref[...].astype(jnp.float32)                # (TB, N)  in {0,1}
    query = query_ref[...]                                   # (TB, Q)
    align = align_ref[...]                                   # (TB, N) int32
    align_maskf = align_mask_ref[...].astype(jnp.float32)    # (TB, N)
    copy_src = copy_src_ref[...].astype(jnp.float32)         # (TB, C)
    wh = wh_ref[...]                                         # (D, A)
    ws = ws_ref[...]                                         # (Q, A)
    vt = vt_ref[...].astype(jnp.float32)                     # (1, A)   (v_transform transposed)

    tb, n, d = cells.shape
    a = wh.shape[-1]
    c = copy_src.shape[-1]

    # ---- base attention logits: Et = tanh(Hi*Wh + St*Ws) * v  (MXU + EUP) ----
    tq = jnp.dot(query, ws, preferred_element_type=jnp.float32)               # (TB, A)
    if n % 8 == 0:
        # One tall MXU matmul; reshape is a layout no-op when N is sublane-aligned.
        hm = jnp.dot(cells.reshape(tb * n, d), wh,
                     preferred_element_type=jnp.float32).reshape(tb, n, a)     # (TB, N, A)
    else:
        # Avoid the hidden VMEM relayout a non-aligned reshape would force.
        hm = jax.lax.dot_general(cells, wh, (((2,), (0,)), ((), ())),
                                 preferred_element_type=jnp.float32)           # (TB, N, A)
    e = jnp.tanh(hm + tq[:, None, :])                                          # (TB, N, A)
    raw = jnp.sum(e * vt.reshape(1, 1, a), axis=-1)                            # (TB, N)

    # ---- _mask_logits (micro-fused: max-reduce for no_cells, single where) ----
    has_cells = jnp.max(maskf, axis=1, keepdims=True) > 0.0                    # (TB, 1) bool
    orig_logits = jnp.where((maskf == 0.0) & has_cells, jnp.float32(-jnp.inf), raw)

    # ---- soft copy: exp_logits[b,j] += copy_source[b, alignments[b,j]] ----
    # Shift by m = max(orig_logits, 0): weights/logits mathematically identical, but exp cannot
    # overflow for large logits and exp(-m) <= 1 so the boost rescale cannot overflow either.
    m = jnp.maximum(jnp.max(orig_logits, axis=1, keepdims=True), 0.0)          # (TB, 1), finite
    exp_shift = jnp.exp(orig_logits - m)                                        # masked -> exactly 0

    # Lane gather has no native TPU op: fused compare/select over the candidate axis
    # (no separate f32 one-hot temporary, no extra VPU multiply).
    cand_iota = jax.lax.broadcasted_iota(jnp.int32, (tb, n, c), 2)
    boost = jnp.sum(jnp.where(align[:, :, None] == cand_iota,
                              copy_src[:, None, :], 0.0), axis=-1)              # (TB, N)
    boost = boost * align_maskf

    boosted = exp_shift + boost * jnp.exp(-m)                                   # == (exp(orig)+boost)*exp(-m)
    normalizer = jnp.sum(boosted, axis=1, keepdims=True)                        # (TB, 1)
    # EUP reciprocal of the tiny (TB,1) normalizer + one Newton step (error ~eps^2, holds 1e-5);
    # turns the full-(TB,N) VPU divide into a broadcast multiply.
    inv = pl.reciprocal(normalizer, approx=True)
    inv = inv * (2.0 - normalizer * inv)
    weights = boosted * inv
    weights = jnp.where(has_cells, weights, 0.0)                                # _mask_weights

    # ---- context = weights @ cells on the MXU (weights in cells' dtype: bf16 stays bf16) ----
    context = jnp.einsum("bqn,bnd->bqd", weights[:, None, :].astype(cells.dtype), cells,
                         preferred_element_type=jnp.float32)[:, 0, :]           # (TB, D)

    logits = jnp.log(boosted) + m                                               # == log(exp(orig)+boost)

    weights_ref[...] = weights.astype(weights_ref.dtype)
    context_ref[...] = context.astype(context_ref.dtype)
    logits_ref[...] = logits.astype(logits_ref.dtype)
    orig_logits_ref[...] = orig_logits.astype(orig_logits_ref.dtype)
    boost_ref[...] = boost.astype(boost_ref.dtype)


def _vmem_limit_bytes():
    try:
        cap = int(pltpu.get_tpu_info().vmem_capacity_bytes)
    except Exception:
        cap = 64 << 20          # conservative fallback = v7x physical VMEM per TensorCore
    return max((cap * 3) // 4, 16 << 20)


def _num_tensorcores():
    try:
        return max(int(getattr(jax.devices()[0], "num_cores", 1) or 1), 1)
    except Exception:
        return 1


def _pick_batch_tile(b, n, d, q, a, c, vmem_limit, num_cores):
    """Largest multiple-of-8 batch tile that (a) divides B, (b) fits the VMEM budget,
    (c) leaves >= 1 grid step per TensorCore when the chip has >1 (v7x megacore)."""
    if b <= 8 or b % 8 != 0:
        return b                                   # tiny/ragged batch: single block, no per-step overhead
    bytes_per_row = 4 * (2 * n * d                 # cells block, double-buffered
                         + 3 * n * a               # Hi*Wh / tanh temporaries
                         + 2 * n * c               # gather select temporary
                         + 2 * (3 * n + c + q)     # small per-row inputs, double-buffered
                         + 2 * (4 * n + d))        # output blocks, double-buffered
    budget = max(vmem_limit // 2, 4 << 20)         # headroom for params + compiler scratch
    tb = min(b, max(8, (budget // max(bytes_per_row, 1)) // 8 * 8))
    if num_cores > 1:                              # keep every TensorCore busy on v7x
        per_core = max(8, (b // num_cores) // 8 * 8)
        tb = min(tb, per_core)
    while b % tb != 0:                             # the grid must tile B exactly
        tb -= 8
    return tb


def soft_copy_attention_forward(memory_values, memory_mask, query,
                                alignments_values, alignments_mask, copy_source,
                                wh, ws, v):
    """memory_values: (B,N,D), memory_mask: (B,N), query: (B,Q), alignments_values: (B,N) int32,
    alignments_mask: (B,N), copy_source: (B,C), wh: (D,A), ws: (Q,A), v: (A,1)."""
    b, n, d = memory_values.shape
    q = query.shape[-1]
    a = wh.shape[-1]
    c = copy_source.shape[-1]

    vmem_limit = _vmem_limit_bytes()
    tb = _pick_batch_tile(b, n, d, q, a, c, vmem_limit, _num_tensorcores())
    grid = (b // tb,)

    row2 = lambda i: (i, 0)
    param2 = lambda i: (0, 0)

    weights, context, logits, orig_logits, boost = pl.pallas_call(
        _soft_copy_attention_kernel,
        grid=grid,
        in_specs=[
            pl.BlockSpec((tb, n, d), lambda i: (i, 0, 0)),   # memory_values
            pl.BlockSpec((tb, n), row2),                      # memory_mask
            pl.BlockSpec((tb, q), row2),                      # query
            pl.BlockSpec((tb, n), row2),                      # alignments_values
            pl.BlockSpec((tb, n), row2),                      # alignments_mask
            pl.BlockSpec((tb, c), row2),                      # copy_source
            pl.BlockSpec((d, a), param2),                     # Wh
            pl.BlockSpec((q, a), param2),                     # Ws
            pl.BlockSpec((1, a), param2),                     # v^T
        ],
        out_specs=(
            pl.BlockSpec((tb, n), row2),                      # weights
            pl.BlockSpec((tb, d), row2),                      # context
            pl.BlockSpec((tb, n), row2),                      # logits
            pl.BlockSpec((tb, n), row2),                      # orig_logits
            pl.BlockSpec((tb, n), row2),                      # boost
        ),
        out_shape=(
            jax.ShapeDtypeStruct((b, n), jnp.float32),
            jax.ShapeDtypeStruct((b, d), jnp.float32),
            jax.ShapeDtypeStruct((b, n), jnp.float32),
            jax.ShapeDtypeStruct((b, n), jnp.float32),
            jax.ShapeDtypeStruct((b, n), jnp.float32),
        ),
        compiler_params=pltpu.CompilerParams(
            dimension_semantics=("parallel",),
            vmem_limit_bytes=int(vmem_limit)),
    )(memory_values, memory_mask, query, alignments_values, alignments_mask,
      copy_source, wh, ws, v.T)

    return SoftCopyAttentionOutput(weights=weights, context=context, logits=logits,
                                   orig_logits=orig_logits, boost=boost)


def _reference(memory_values, memory_mask, query, alignments_values, alignments_mask,
               copy_source, wh, ws, v):
    """Pure-JAX replica of the PyTorch SoftCopyAttention.forward."""
    tq = query @ ws
    e = jnp.tanh(jnp.einsum("bnd,da->bna", memory_values, wh) + tq[:, None, :])
    raw = jnp.einsum("bna,ao->bn", e, v)

    no_cells = jnp.prod(1.0 - memory_mask, axis=1, keepdims=True)
    suppress = jnp.where(memory_mask == 0.0, -jnp.inf, 0.0)
    suppress = jnp.where(no_cells == 1.0, 0.0, suppress)
    orig_logits = raw + suppress

    exp_logits = jnp.exp(orig_logits)
    boost = jnp.take_along_axis(copy_source, alignments_values, axis=1) * alignments_mask
    boosted = exp_logits + boost
    weights = boosted / jnp.sum(boosted, axis=1, keepdims=True)
    weights = jnp.where(no_cells == 1.0, 0.0, weights)
    context = jnp.einsum("bn,bnd->bd", weights, memory_values)
    logits = jnp.log(boosted)
    return SoftCopyAttentionOutput(weights, context, logits, orig_logits, boost)


if __name__ == "__main__":
    B, N = 2, 8                 # batch, num memory cells
    MEMORY_DIM = 32
    QUERY_DIM = 16
    ATTN_DIM = 32
    NUM_CANDIDATES = 8          # copy_source candidates

    key = jax.random.PRNGKey(0)
    k_cells, k_query, k_align, k_copy, k_wh, k_ws, k_v = jax.random.split(key, 7)

    memory_values = jax.random.normal(k_cells, (B, N, MEMORY_DIM), jnp.float32)
    query = jax.random.normal(k_query, (B, QUERY_DIM), jnp.float32)

    # memory mask: first batch has 5 valid cells, second has all 8
    lengths = jnp.array([5, 8])
    memory_mask = (jnp.arange(N)[None, :] < lengths[:, None]).astype(jnp.float32)

    # alignments mask is a strict subset of the memory mask (satisfies _is_subset)
    align_lengths = jnp.array([3, 6])
    alignments_mask = (jnp.arange(N)[None, :] < align_lengths[:, None]).astype(jnp.float32)
    alignments_values = jax.random.randint(k_align, (B, N), 0, NUM_CANDIDATES, dtype=jnp.int32)
    alignments_values = alignments_values * alignments_mask.astype(jnp.int32)  # 0 where no alignment

    copy_source = jax.random.uniform(k_copy, (B, NUM_CANDIDATES), jnp.float32)

    # Parameter init mirroring Attention._initialize_weight_matrix (uniform(-1/sqrt(in), 1/sqrt(in)))
    def init_w(k, in_dim, out_dim):
        s = 1.0 / math.sqrt(in_dim)
        return jax.random.uniform(k, (in_dim, out_dim), jnp.float32, minval=-s, maxval=s)

    wh = init_w(k_wh, MEMORY_DIM, ATTN_DIM)     # memory_transform
    ws = init_w(k_ws, QUERY_DIM, ATTN_DIM)      # query_transform
    v = init_w(k_v, ATTN_DIM, 1)                # v_transform

    out = soft_copy_attention_forward(memory_values, memory_mask, query,
                                      alignments_values, alignments_mask, copy_source,
                                      wh, ws, v)
    jax.block_until_ready(out)

    ref = _reference(memory_values, memory_mask, query, alignments_values, alignments_mask,
                     copy_source, wh, ws, v)
    np.testing.assert_allclose(np.asarray(out.weights), np.asarray(ref.weights), rtol=1e-5, atol=1e-5)
    np.testing.assert_allclose(np.asarray(out.context), np.asarray(ref.context), rtol=1e-5, atol=1e-5)
    np.testing.assert_allclose(np.asarray(out.logits), np.asarray(ref.logits), rtol=1e-5, atol=1e-5)
    np.testing.assert_allclose(np.asarray(out.orig_logits), np.asarray(ref.orig_logits), rtol=1e-5, atol=1e-5)
    np.testing.assert_allclose(np.asarray(out.boost), np.asarray(ref.boost), rtol=1e-5, atol=1e-5)

    print("KERNEL_OK")
</pallas_src>

<mosaic_0001>
module attributes {stable_mosaic.version = 11 : i64} {
  func.func @_soft_copy_attention_kernel(%arg0: i32, %arg1: memref<2x8x32xf32, #tpu.memory_space<vmem>>, %arg2: memref<2x8xf32, #tpu.memory_space<vmem>>, %arg3: memref<2x16xf32, #tpu.memory_space<vmem>>, %arg4: memref<2x8xi32, #tpu.memory_space<vmem>>, %arg5: memref<2x8xf32, #tpu.memory_space<vmem>>, %arg6: memref<2x8xf32, #tpu.memory_space<vmem>>, %arg7: memref<32x32xf32, #tpu.memory_space<vmem>>, %arg8: memref<16x32xf32, #tpu.memory_space<vmem>>, %arg9: memref<1x32xf32, #tpu.memory_space<vmem>>, %arg10: memref<2x8xf32, #tpu.memory_space<vmem>>, %arg11: memref<2x32xf32, #tpu.memory_space<vmem>>, %arg12: memref<2x8xf32, #tpu.memory_space<vmem>>, %arg13: memref<2x8xf32, #tpu.memory_space<vmem>>, %arg14: memref<2x8xf32, #tpu.memory_space<vmem>>) attributes {dimension_semantics = [#tpu.dimension_semantics<parallel>], iteration_bounds = array<i64: 1>, scalar_prefetch = 0 : i64, scratch_operands = 0 : i64, tpu.core_type = #tpu.core_type<tc>, window_params = [{transform_indices = @transform_0, window_bounds = array<i64: 2, 8, 32>}, {transform_indices = @transform_1, window_bounds = array<i64: 2, 8>}, {transform_indices = @transform_2, window_bounds = array<i64: 2, 16>}, {transform_indices = @transform_3, window_bounds = array<i64: 2, 8>}, {transform_indices = @transform_4, window_bounds = array<i64: 2, 8>}, {transform_indices = @transform_5, window_bounds = array<i64: 2, 8>}, {pipeline_mode = #tpu.pipeline_mode<synchronous>, transform_indices = @transform_6, window_bounds = array<i64: 32, 32>}, {pipeline_mode = #tpu.pipeline_mode<synchronous>, transform_indices = @transform_7, window_bounds = array<i64: 16, 32>}, {pipeline_mode = #tpu.pipeline_mode<synchronous>, transform_indices = @transform_8, window_bounds = array<i64: 1, 32>}, {transform_indices = @transform_9, window_bounds = array<i64: 2, 8>}, {transform_indices = @transform_10, window_bounds = array<i64: 2, 32>}, {transform_indices = @transform_11, window_bounds = array<i64: 2, 8>}, {transform_indices = @transform_12, window_bounds = array<i64: 2, 8>}, {transform_indices = @transform_13, window_bounds = array<i64: 2, 8>}]} {
    %c0 = arith.constant 0 : index
    %c0_0 = arith.constant 0 : index
    %c0_1 = arith.constant 0 : index
    %0 = vector.load %arg1[%c0, %c0_0, %c0_1] : memref<2x8x32xf32, #tpu.memory_space<vmem>>, vector<2x8x32xf32>
    %c0_2 = arith.constant 0 : index
    %c0_3 = arith.constant 0 : index
    %1 = vector.load %arg2[%c0_2, %c0_3] : memref<2x8xf32, #tpu.memory_space<vmem>>, vector<2x8xf32>
    %c0_4 = arith.constant 0 : index
    %c0_5 = arith.constant 0 : index
    %2 = vector.load %arg3[%c0_4, %c0_5] : memref<2x16xf32, #tpu.memory_space<vmem>>, vector<2x16xf32>
    %c0_6 = arith.constant 0 : index
    %c0_7 = arith.constant 0 : index
    %3 = vector.load %arg4[%c0_6, %c0_7] : memref<2x8xi32, #tpu.memory_space<vmem>>, vector<2x8xi32>
    %c0_8 = arith.constant 0 : index
    %c0_9 = arith.constant 0 : index
    %4 = vector.load %arg5[%c0_8, %c0_9] : memref<2x8xf32, #tpu.memory_space<vmem>>, vector<2x8xf32>
    %c0_10 = arith.constant 0 : index
    %c0_11 = arith.constant 0 : index
    %5 = vector.load %arg6[%c0_10, %c0_11] : memref<2x8xf32, #tpu.memory_space<vmem>>, vector<2x8xf32>
    %c0_12 = arith.constant 0 : index
    %c0_13 = arith.constant 0 : index
    %6 = vector.load %arg7[%c0_12, %c0_13] : memref<32x32xf32, #tpu.memory_space<vmem>>, vector<32x32xf32>
    %c0_14 = arith.constant 0 : index
    %c0_15 = arith.constant 0 : index
    %7 = vector.load %arg8[%c0_14, %c0_15] : memref<16x32xf32, #tpu.memory_space<vmem>>, vector<16x32xf32>
    %c0_16 = arith.constant 0 : index
    %c0_17 = arith.constant 0 : index
    %8 = vector.load %arg9[%c0_16, %c0_17] : memref<1x32xf32, #tpu.memory_space<vmem>>, vector<1x32xf32>
    %cst = arith.constant dense<0.000000e+00> : vector<2x32xf32>
    %9 = tpu.matmul %2, %7, %cst {dimension_numbers = #tpu.dot_dimension_numbers<[1], [0], [0], [1], [0, 0, 1, 1], [], []>} : vector<2x16xf32>, vector<16x32xf32>, vector<2x32xf32> -> vector<2x32xf32>
    %10 = vector.shape_cast %0 : vector<2x8x32xf32> to vector<16x32xf32>
    %cst_18 = arith.constant dense<0.000000e+00> : vector<16x32xf32>
    %11 = tpu.matmul %10, %6, %cst_18 {dimension_numbers = #tpu.dot_dimension_numbers<[1], [0], [0], [1], [0, 0, 1, 1], [], []>} : vector<16x32xf32>, vector<32x32xf32>, vector<16x32xf32> -> vector<16x32xf32>
    %12 = vector.shape_cast %11 : vector<16x32xf32> to vector<2x8x32xf32>
    %13 = vector.shape_cast %9 : vector<2x32xf32> to vector<2x1x32xf32>
    %14 = vector.broadcast %13 : vector<2x1x32xf32> to vector<2x8x32xf32>
    %15 = arith.addf %12, %14 : vector<2x8x32xf32>
    %16 = math.tanh %15 : vector<2x8x32xf32>
    %17 = vector.shape_cast %8 : vector<1x32xf32> to vector<1x1x32xf32>
    %18 = vector.broadcast %17 : vector<1x1x32xf32> to vector<2x8x32xf32>
    %19 = arith.mulf %16, %18 : vector<2x8x32xf32>
    %cst_19 = arith.constant dense<0.000000e+00> : vector<2x8xf32>
    %20 = vector.multi_reduction <add>, %19, %cst_19 [2] : vector<2x8x32xf32> to vector<2x8xf32>
    %cst_20 = arith.constant dense<0xFF800000> : vector<2xf32>
    %21 = vector.multi_reduction <maximumf>, %1, %cst_20 [1] : vector<2x8xf32> to vector<2xf32>
    %22 = vector.shape_cast %21 : vector<2xf32> to vector<2x1xf32>
    %cst_21 = arith.constant 0.000000e+00 : f32
    %23 = vector.broadcast %cst_21 : f32 to vector<2x1xf32>
    %24 = arith.cmpf ogt, %22, %23 : vector<2x1xf32>
    %cst_22 = arith.constant 0.000000e+00 : f32
    %25 = vector.broadcast %cst_22 : f32 to vector<2x8xf32>
    %26 = arith.cmpf oeq, %1, %25 : vector<2x8xf32>
    %27 = vector.broadcast %24 : vector<2x1xi1> to vector<2x8xi1>
    %28 = arith.andi %26, %27 : vector<2x8xi1>
    %cst_23 = arith.constant 0xFF800000 : f32
    %29 = vector.broadcast %cst_23 : f32 to vector<2x8xf32>
    %30 = arith.select %28, %29, %20 : vector<2x8xi1>, vector<2x8xf32>
    %cst_24 = arith.constant dense<0xFF800000> : vector<2xf32>
    %31 = vector.multi_reduction <maximumf>, %30, %cst_24 [1] : vector<2x8xf32> to vector<2xf32>
    %32 = vector.shape_cast %31 : vector<2xf32> to vector<2x1xf32>
    %cst_25 = arith.constant 0.000000e+00 : f32
    %33 = vector.broadcast %cst_25 : f32 to vector<2x1xf32>
    %34 = arith.maximumf %32, %33 : vector<2x1xf32>
    %35 = vector.broadcast %34 : vector<2x1xf32> to vector<2x8xf32>
    %36 = arith.subf %30, %35 : vector<2x8xf32>
    %37 = math.exp %36 : vector<2x8xf32>
    %38 = tpu.iota {dimensions = array<i32: 2>} : vector<2x8x8xi32>
    %39 = vector.shape_cast %3 : vector<2x8xi32> to vector<2x8x1xi32>
    %40 = vector.broadcast %39 : vector<2x8x1xi32> to vector<2x8x8xi32>
    %41 = arith.cmpi eq, %40, %38 : vector<2x8x8xi32>
    %42 = vector.shape_cast %5 : vector<2x8xf32> to vector<2x1x8xf32>
    %cst_26 = arith.constant 0.000000e+00 : f32
    %43 = vector.shape_cast %42 : vector<2x1x8xf32> to vector<2x1x8xf32>
    %44 = vector.broadcast %43 : vector<2x1x8xf32> to vector<2x8x8xf32>
    %45 = vector.broadcast %cst_26 : f32 to vector<2x8x8xf32>
    %46 = arith.select %41, %44, %45 : vector<2x8x8xi1>, vector<2x8x8xf32>
    %cst_27 = arith.constant dense<0.000000e+00> : vector<2x8xf32>
    %47 = vector.multi_reduction <add>, %46, %cst_27 [2] : vector<2x8x8xf32> to vector<2x8xf32>
    %48 = arith.mulf %47, %4 : vector<2x8xf32>
    %cst_28 = arith.constant 0.000000e+00 : f32
    %49 = vector.broadcast %cst_28 : f32 to vector<2x1xf32>
    %50 = arith.subf %49, %34 : vector<2x1xf32>
    %51 = math.exp %50 : vector<2x1xf32>
    %52 = vector.broadcast %51 : vector<2x1xf32> to vector<2x8xf32>
    %53 = arith.mulf %48, %52 : vector<2x8xf32>
    %54 = arith.addf %37, %53 : vector<2x8xf32>
    %cst_29 = arith.constant dense<0.000000e+00> : vector<2xf32>
    %55 = vector.multi_reduction <add>, %54, %cst_29 [1] : vector<2x8xf32> to vector<2xf32>
    %56 = vector.shape_cast %55 : vector<2xf32> to vector<2x1xf32>
    %57 = tpu.reciprocal %56 {approx = true} : vector<2x1xf32> -> vector<2x1xf32>
    %58 = arith.mulf %56, %57 : vector<2x1xf32>
    %cst_30 = arith.constant 2.000000e+00 : f32
    %59 = vector.broadcast %cst_30 : f32 to vector<2x1xf32>
    %60 = arith.subf %59, %58 : vector<2x1xf32>
    %61 = arith.mulf %57, %60 : vector<2x1xf32>
    %62 = vector.broadcast %61 : vector<2x1xf32> to vector<2x8xf32>
    %63 = arith.mulf %54, %62 : vector<2x8xf32>
    %cst_31 = arith.constant 0.000000e+00 : f32
    %64 = vector.shape_cast %24 : vector<2x1xi1> to vector<2x1xi1>
    %65 = vector.broadcast %64 : vector<2x1xi1> to vector<2x8xi1>
    %66 = vector.broadcast %cst_31 : f32 to vector<2x8xf32>
    %67 = arith.select %65, %63, %66 : vector<2x8xi1>, vector<2x8xf32>
    %68 = vector.shape_cast %67 : vector<2x8xf32> to vector<2x1x8xf32>
    "tpu.trace_start"() <{level = 10 : i32, message = "bqn,bnd->bqd"}> : () -> ()
    %cst_32 = arith.constant dense<0.000000e+00> : vector<2x1x32xf32>
    %69 = tpu.matmul %68, %0, %cst_32 {dimension_numbers = #tpu.dot_dimension_numbers<[2], [1], [1], [2], [0, 0, 0, 1, 1, 2], [0], [0]>} : vector<2x1x8xf32>, vector<2x8x32xf32>, vector<2x1x32xf32> -> vector<2x1x32xf32>
    "tpu.trace_stop"() : () -> ()
    %70 = vector.shape_cast %69 : vector<2x1x32xf32> to vector<2x32xf32>
    %71 = math.log %54 : vector<2x8xf32>
    %72 = vector.broadcast %34 : vector<2x1xf32> to vector<2x8xf32>
    %73 = arith.addf %71, %72 : vector<2x8xf32>
    %c0_33 = arith.constant 0 : index
    %c0_34 = arith.constant 0 : index
    %74 = vector.load %arg10[%c0_33, %c0_34] : memref<2x8xf32, #tpu.memory_space<vmem>>, vector<2x8xf32>
    tpu.vector_store %arg10[%c0_33, %c0_34], %67 {strides = array<i32>} : memref<2x8xf32, #tpu.memory_space<vmem>>, vector<2x8xf32>,
    %c0_35 = arith.constant 0 : index
    %c0_36 = arith.constant 0 : index
    %75 = vector.load %arg11[%c0_35, %c0_36] : memref<2x32xf32, #tpu.memory_space<vmem>>, vector<2x32xf32>
    tpu.vector_store %arg11[%c0_35, %c0_36], %70 {strides = array<i32>} : memref<2x32xf32, #tpu.memory_space<vmem>>, vector<2x32xf32>,
    %c0_37 = arith.constant 0 : index
    %c0_38 = arith.constant 0 : index
    %76 = vector.load %arg12[%c0_37, %c0_38] : memref<2x8xf32, #tpu.memory_space<vmem>>, vector<2x8xf32>
    tpu.vector_store %arg12[%c0_37, %c0_38], %73 {strides = array<i32>} : memref<2x8xf32, #tpu.memory_space<vmem>>, vector<2x8xf32>,
    %c0_39 = arith.constant 0 : index
    %c0_40 = arith.constant 0 : index
    %77 = vector.load %arg13[%c0_39, %c0_40] : memref<2x8xf32, #tpu.memory_space<vmem>>, vector<2x8xf32>
    tpu.vector_store %arg13[%c0_39, %c0_40], %30 {strides = array<i32>} : memref<2x8xf32, #tpu.memory_space<vmem>>, vector<2x8xf32>,
    %c0_41 = arith.constant 0 : index
    %c0_42 = arith.constant 0 : index
    %78 = vector.load %arg14[%c0_41, %c0_42] : memref<2x8xf32, #tpu.memory_space<vmem>>, vector<2x8xf32>
    tpu.vector_store %arg14[%c0_41, %c0_42], %48 {strides = array<i32>} : memref<2x8xf32, #tpu.memory_space<vmem>>, vector<2x8xf32>,
    return
  }
  func.func @transform_0(%arg0: i32) -> (i32, i32, i32) {
    %c0_i32 = arith.constant 0 : i32
    %c0_i32_0 = arith.constant 0 : i32
    %c0_i32_1 = arith.constant 0 : i32
    return %arg0, %c0_i32, %c0_i32_0 : i32, i32, i32
  }
  func.func @transform_1(%arg0: i32) -> (i32, i32) {
    %c0_i32 = arith.constant 0 : i32
    %c0_i32_0 = arith.constant 0 : i32
    return %arg0, %c0_i32 : i32, i32
  }
  func.func @transform_2(%arg0: i32) -> (i32, i32) {
    %c0_i32 = arith.constant 0 : i32
    %c0_i32_0 = arith.constant 0 : i32
    return %arg0, %c0_i32 : i32, i32
  }
  func.func @transform_3(%arg0: i32) -> (i32, i32) {
    %c0_i32 = arith.constant 0 : i32
    %c0_i32_0 = arith.constant 0 : i32
    return %arg0, %c0_i32 : i32, i32
  }
  func.func @transform_4(%arg0: i32) -> (i32, i32) {
    %c0_i32 = arith.constant 0 : i32
    %c0_i32_0 = arith.constant 0 : i32
    return %arg0, %c0_i32 : i32, i32
  }
  func.func @transform_5(%arg0: i32) -> (i32, i32) {
    %c0_i32 = arith.constant 0 : i32
    %c0_i32_0 = arith.constant 0 : i32
    return %arg0, %c0_i32 : i32, i32
  }
  func.func @transform_6(%arg0: i32) -> (i32, i32) {
    %c0_i32 = arith.constant 0 : i32
    %c0_i32_0 = arith.constant 0 : i32
    %c0_i32_1 = arith.constant 0 : i32
    return %c0_i32, %c0_i32_0 : i32, i32
  }
  func.func @transform_7(%arg0: i32) -> (i32, i32) {
    %c0_i32 = arith.constant 0 : i32
    %c0_i32_0 = arith.constant 0 : i32
    %c0_i32_1 = arith.constant 0 : i32
    return %c0_i32, %c0_i32_0 : i32, i32
  }
  func.func @transform_8(%arg0: i32) -> (i32, i32) {
    %c0_i32 = arith.constant 0 : i32
    %c0_i32_0 = arith.constant 0 : i32
    %c0_i32_1 = arith.constant 0 : i32
    return %c0_i32, %c0_i32_0 : i32, i32
  }
  func.func @transform_9(%arg0: i32) -> (i32, i32) {
    %c0_i32 = arith.constant 0 : i32
    %c0_i32_0 = arith.constant 0 : i32
    return %arg0, %c0_i32 : i32, i32
  }
  func.func @transform_10(%arg0: i32) -> (i32, i32) {
    %c0_i32 = arith.constant 0 : i32
    %c0_i32_0 = arith.constant 0 : i32
    return %arg0, %c0_i32 : i32, i32
  }
  func.func @transform_11(%arg0: i32) -> (i32, i32) {
    %c0_i32 = arith.constant 0 : i32
    %c0_i32_0 = arith.constant 0 : i32
    return %arg0, %c0_i32 : i32, i32
  }
  func.func @transform_12(%arg0: i32) -> (i32, i32) {
    %c0_i32 = arith.constant 0 : i32
    %c0_i32_0 = arith.constant 0 : i32
    return %arg0, %c0_i32 : i32, i32
  }
  func.func @transform_13(%arg0: i32) -> (i32, i32) {
    %c0_i32 = arith.constant 0 : i32
    %c0_i32_0 = arith.constant 0 : i32
    return %arg0, %c0_i32 : i32, i32
  }
}

</mosaic_0001>

<bundles_post_ra>
// kernel: tpu_custom_call.1
= control target key start
LH: loop header
LB: loop body
LE: loop exit
PB: predicated region body
PF: predicated region fallthrough
CT: control target
= control target key end

     0   :  { %19 = vsyncpa [#allocation3], 0  ;;  %s961_s0 = inlined_call_operand.hbm [shape: f32[2,8,32], index: 0, kind: input, shape index: {}]   ;;  %s962_s1 = inlined_call_operand.hbm [shape: f32[2,8], index: 1, kind: input, shape index: {}]   ;;  %s963_s2 = inlined_call_operand.hbm [shape: f32[2,16], index: 2, kind: input, shape index: {}]   ;;  %s964_s3 = inlined_call_operand.vmem [shape: s32[2,8], index: 3, kind: input, shape index: {}]   ;;  %s965_s4 = inlined_call_operand.hbm [shape: f32[2,8], index: 4, kind: input, shape index: {}]   ;;  %s966_s5 = inlined_call_operand.vmem [shape: f32[2,8], index: 5, kind: input, shape index: {}]   ;;  %s967_s6 = inlined_call_operand.hbm [shape: f32[32,32], index: 6, kind: input, shape index: {}]   ;;  %s968_s7 = inlined_call_operand.hbm [shape: f32[16,32], index: 7, kind: input, shape index: {}]   ;;  %s969_s8 = inlined_call_operand.vmem [shape: f32[1,32], index: 8, kind: input, shape index: {}]   ;;  %s970_s9 = inlined_call_operand.hbm [shape: f32[2,8], index: 9, kind: output, shape index: {0}]   ;;  %s971_s10 = inlined_call_operand.hbm [shape: f32[2,32], index: 10, kind: output, shape index: {1}]   ;;  %s972_s11 = inlined_call_operand.hbm [shape: f32[2,8], index: 11, kind: output, shape index: {2}]   ;;  %s973_s12 = inlined_call_operand.hbm [shape: f32[2,8], index: 12, kind: output, shape index: {3}]   ;;  %s974_s13 = inlined_call_operand.hbm [shape: f32[2,8], index: 13, kind: output, shape index: {4}]  }
   0x1   :  { %20 = vsyncpa [#allocation6], 0 }
   0x2   :  { %21 = vsyncpa [#allocation9], 0 }
   0x3   :  { %22 = vsyncpa [#allocation12], 0 }
   0x4   :  { %23 = vsyncpa [#allocation4], 0 }
   0x5   :  { %24 = vsyncpa [#allocation15], 0  ;;  %s44_s27 = sshll.u32 %s962_s1, 4  ;;  %s45_s27 = int_to_ptr.hbm [resolvable:$true] %s44_s27 }
   0x6   :  { %25 = vsyncpa [#allocation18], 0  ;;  %s795_s28 = smov [#allocation5]   ;;  %s68_s15 = sshll.u32 %s965_s4, 4  ;;  %s69_s15 = int_to_ptr.hbm [resolvable:$true] %s68_s15 }
   0x7   :  { %s46_s29 = sshll.u32 %s795_s28, 4  ;;  %s796_s16 = smov [#allocation8]   ;;  %s47_s29 = int_to_ptr.vmem [resolvable:$true] %s46_s29 }
   0x8   :  { %49 = dma.hbm_to_vmem [thread:$0]  %s45_s27, 32, %s47_s29, [#allocation6]  }
   0x9   :  { %s70_s17 = sshll.u32 %s796_s16, 4  ;;  %s30_s20 = sshll.u32 %s961_s0, 4  ;;  %s71_s17 = int_to_ptr.vmem [resolvable:$true] %s70_s17  ;;  %s31_s20 = int_to_ptr.hbm [resolvable:$true] %s30_s20 }
   0xa   :  { %73 = dma.hbm_to_vmem [thread:$0]  %s69_s15, 32, %s71_s17, [#allocation9]  }
   0xb   :  { %s797_s1 = smov [#allocation2]   ;;  %s55_s24 = sshll.u32 %s963_s2, 4  ;;  %s56_s24 = int_to_ptr.hbm [resolvable:$true] %s55_s24 }
   0xc   :  { %s32_s21 = sshll.u32 %s797_s1, 4  ;;  %s798_s25 = smov 128   ;;  %s33_s21 = int_to_ptr.vmem [resolvable:$true] %s32_s21 }
   0xd   :  { %s799_s4 = smov 8   ;;  %s800_s26 = smov [#allocation7]  }
   0xe   :  { %38 = dma.hbm_to_vmem [thread:$0]  %s31_s20, 256, %s33_s21, [#allocation3], %s798_s25, %s798_s25, %s799_s4  }
   0xf   :  { %s57_s27 = sshll.u32 %s800_s26, 4  ;;  %s80_s0 = sshll.u32 %s967_s6, 4  ;;  %s58_s27 = int_to_ptr.vmem [resolvable:$true] %s57_s27  ;;  %s81_s0 = int_to_ptr.hbm [resolvable:$true] %s80_s0 }
  0x10   :  { %60 = dma.hbm_to_vmem [thread:$0]  %s56_s24, 32, %s58_s27, [#allocation6]  }
  0x11   :  { %s93_s15 = sshll.u32 %s968_s7, 4  ;;  %s801_s16 = smov [#allocation10]   ;;  %s94_s15 = int_to_ptr.hbm [resolvable:$true] %s93_s15 }
  0x12   :  { %s82_s17 = sshll.u32 %s801_s16, 4  ;;  %s802_s2 = smov [#allocation11]   ;;  %s83_s17 = int_to_ptr.vmem [resolvable:$true] %s82_s17 }
  0x13   :  { %88 = dma.hbm_to_vmem [thread:$0]  %s81_s0, 512, %s83_s17, [#allocation9], %s798_s25, %s798_s25, %s799_s4  }
  0x14   :  { %s95_s18 = sshll.u32 %s802_s2, 4  ;;  %s96_s18 = int_to_ptr.vmem [resolvable:$true] %s95_s18 }
  0x15   :  { %101 = dma.hbm_to_vmem [thread:$0]  %s94_s15, 256, %s96_s18, [#allocation12], %s798_s25, %s798_s25, %s799_s4  }
  0x16   :  { %781 = dma.done.wait [#allocation3], 256  }
  0x17   :  { %782 = vsyncadd [#allocation3], 4294967040 }
  0x18   :  { %783 = dma.done.wait [#allocation6], 64  }
  0x19   :  { %784 = vsyncadd [#allocation6], 4294967232 }
  0x1a   :  { %785 = dma.done.wait [#allocation9], 544  }
  0x1b   :  { %786 = vsyncadd [#allocation9], 4294966752 }
  0x1c   :  { %787 = dma.done.wait [#allocation12], 256  }
  0x1d   :  { %788 = vsyncadd [#allocation12], 4294967040  ;;  %v228_v0 = vlaneseq  ;;  %v138_v2 = vld [vmem:[#allocation10 + $0x18] sm:$0xff]  ;;  %v140_v3 = vld [vmem:[#allocation11 + $0x8] sm:$0xff]  ;;  %vm142_vm0 = vcmask 130048   ;;  %vm217_vm1 = vcmask 58368  }
  0x1e   :  { %v137_v4 = vld [vmem:[#allocation10 + $0x10] sm:$0xff]  ;;  %185 = vmatpush.msra.mxu1 %v138_v2  ;;  %160 = vmatpush.msra.mxu0 %v140_v3  ;;  %v139_v5 = vld [vmem:[#allocation11] sm:$0xff]  ;;  %v131_v6 = vld [vmem:[#allocation7] sm:$0x3]  ;;  %vm166_vm2 = vcmask 261120   ;;  %vm267_vm4 = vcmask 64512  }
  0x1f   :  { %v245_v1 = vshrl.u32 %v228_v0, 7  ;;  %v136_v7 = vld [vmem:[#allocation10 + $0x8] sm:$0xff]  ;;  %v897_v9 = vld [vmem:[#allocation5] sm:$0x3]  ;;  %v135_v11 = vld [vmem:[#allocation10] sm:$0xff]  ;;  %v912_v31 = vand.u32 127, %v228_v0 }
  0x20   :  { %v128_v8 = vld [vmem:[#allocation2] sm:$0xff]  ;;  %186 = vmatpush.msra.mxu1 %v137_v4  ;;  %161 = vmatpush.msra.mxu0 %v139_v5  ;;  %v218_v12 = vsel %vm217_vm1, %v897_v9, -inf  ;;  %v129_v14 = vld [vmem:[#allocation2 + $0x8] sm:$0xff]  ;;  %v133_v16 = vld [vmem:[#allocation8] sm:$0x3]  ;;  %vm222_vm6 = vcmp.eq.f32.partialorder %v897_v9, 0.0 }
  0x21   :  { %498 = vset.pattern.permute.xlu1 %v245_v1  ;;  %499 = vset.pattern.permute.xlu2 %v245_v1  ;;  %v132_v10 = vld [vmem:[%s964_s3] sm:$0x3]  ;;  %v282_v17 = vperm.slane %v133_v16, 1  ;;  %v275_v45 = vperm.slane %v133_v16, 0  ;;  %vm232_vm8 = vcmask 1041409   ;;  %v803_v53 = vmov 0  }
  0x22   :  { %500 = vset.pattern.permute.xlu0 %v245_v1  ;;  %479 = vmatmul.msk.f32.vlgmr.msra.gmra.mxu0 %vm142_vm0, %v131_v6  ;;  %v250_v13 = vperm.slane %v132_v10, 1  ;;  %v243_v15 = vperm.slane %v132_v10, 0  ;;  %v504_v23 = vld [vmem:[%s969_s8] ss:$0 sm:$0xff]  ;;  %s437_s23 = sshll.u32 %s973_s12, 4  ;;  %s404_s4 = sshll.u32 %s970_s9, 4  ;;  %s438_s23 = int_to_ptr.hbm [resolvable:$true] %s437_s23  ;;  %s405_s4 = int_to_ptr.hbm [resolvable:$true] %s404_s4 }
  0x23   :  { %344 = vmatpush.msra.mxu2 %v128_v8  ;;  %187 = vmatpush.msra.mxu1 %v136_v7  ;;  %v134_v32 = vld [vmem:[%s966_s5] sm:$0x3]  ;;  %s804_s5 = smov [#allocation17]   ;;  %s805_s26 = smov [#allocation13]   ;;  %vm380_vm10 = vcmask 254976  }
  0x24   :  { %219 = vmax.xlane.f32.xlu1 %v218_v12  ;;  %366 = vmatpush.msra.mxu3 %v129_v14  ;;  %v261_v36 = vperm.slane %v134_v32, 0  ;;  %v260_v39 = vrot.slane %v134_v32, 1  ;;  %s435_s8 = sshll.u32 %s804_s5, 4  ;;  %s402_s27 = sshll.u32 %s805_s26, 4  ;;  %s436_s8 = int_to_ptr.vmem [resolvable:$true] %s435_s8  ;;  %s403_s27 = int_to_ptr.vmem [resolvable:$true] %s402_s27 }
  0x25   :  { %188 = vmatpush.msra.mxu1 %v135_v11  ;;  %s448_s0 = sshll.u32 %s974_s13, 4  ;;  %s806_s30 = smov [#allocation19]   ;;  %s449_s0 = int_to_ptr.hbm [resolvable:$true] %s448_s0 }
  0x26   :  { %480 = vmatmul.msk.f32.vlgmr.msra.gmra.mxu1 %vm166_vm2, %v128_v8  ;;  %v262_v42 = vperm.slane %v260_v39, 0  ;;  %s446_s14 = sshll.u32 %s806_s30, 4  ;;  %s807_s12 = smov [#allocation14]   ;;  %s447_s14 = int_to_ptr.vmem [resolvable:$true] %s446_s14 }
  0x27   :  { %s413_s15 = sshll.u32 %s807_s12, 4  ;;  %s415_s9 = sshll.u32 %s971_s10, 4  ;;  %s414_s15 = int_to_ptr.vmem [resolvable:$true] %s413_s15  ;;  %s416_s9 = int_to_ptr.hbm [resolvable:$true] %s415_s9 }
  0x28   :  { %s808_s2 = smov [#allocation16]   ;;  %s426_s3 = sshll.u32 %s972_s11, 4  ;;  %s427_s3 = int_to_ptr.hbm [resolvable:$true] %s426_s3 }
  0x29   :  { %255 = vperm.xlu2 %499, %v250_v13   ;;  %s424_s18 = sshll.u32 %s808_s2, 4  ;;  %s425_s18 = int_to_ptr.vmem [resolvable:$true] %s424_s18 }
  0x2e   :  { %481 = vmatmul.msk.f32.gmra.mxu1 %vm166_vm2, %v129_v14 }
  0x31   :  { %502 = vset.pattern.permute.xlu2 %v803_v53 }
  0x3d   :  { %248 = vperm.xlu1 %498, %v243_v15  }
  0x45   :  { %287 = vperm.xlu1 %498, %v282_v17  }
  0x4d   :  { %501 = vset.pattern.permute.xlu1 %v803_v53 }
  0x83   :  { %v256_v40 = vpop.permute.xlu2 %255 }
  0x84   :  { %vm258_vm5 = vcmp.eq.s32.totalorder %v256_v40, %v912_v31 }
  0x85   :  { %v266_v43 = vsel %vm258_vm5, %v262_v42, 0.0 }
  0x86   :  { %v271_v44 = vsel %vm267_vm4, %v266_v43, 0.0 }
  0x97   :  { %v909_v25 = vpop.xlane.xlu1 %219 }
  0x98   :  { %vm221_vm7 = vcmp.gt.f32.partialorder %v909_v25, 0.0 }
  0x99   :  { %vm225_vm9 = vmand %vm222_vm6, %vm221_vm7 }
  0x9f   :  { %v163_v18 = vpop.f32.mrf.mxu0 }
  0xa0   :  { %v198_v19 = vperm.slane %v163_v18, 0  ;;  %v197_v22 = vrot.slane %v163_v18, 1 }
  0xa2   :  { %v199_v24 = vperm.slane %v197_v22, 0 }
  0xa3   :  { %v190_v20 = vpop.f32.mrf.mxu1 }
  0xa4   :  { %v202_v21 = vadd.f32 %v198_v19, %v190_v20 }
  0xa6   :  { %505 = vtanh.f32 %v202_v21 }
  0xab   :  { %v193_v26 = vpop.f32.mrf.mxu1 }
  0xac   :  { %v506_v27 = vpop.eup %505  ;;  %v203_v28 = vadd.f32 %v199_v24, %v193_v26 }
  0xad   :  { %v209_v29 = vmul.f32 %v506_v27, %v504_v23 }
  0xae   :  { %507 = vtanh.f32 %v203_v28 }
  0xaf   :  { %v211_v30 = vsel %vm166_vm2, %v209_v29, 0.0  ;;  %v249_v34 = vpop.permute.xlu1 %248 }
  0xb0   :  { %212 = vadd.xlane.f32.xlu0 %v211_v30  ;;  %vm257_vm3 = vcmp.eq.s32.totalorder %v249_v34, %v912_v31 }
  0xb1   :  { %v265_v38 = vsel %vm257_vm3, %v261_v36, 0.0 }
  0xb2   :  { %v268_v41 = vsel %vm267_vm4, %v265_v38, 0.0 }
  0xb4   :  { %v508_v33 = vpop.eup %507 }
  0xb5   :  { %v210_v35 = vmul.f32 %v508_v33, %v504_v23 }
  0xb7   :  { %v214_v37 = vsel %vm166_vm2, %v210_v35, 0.0  ;;  %v288_v2 = vpop.permute.xlu1 %287 }
  0xb8   :  { %215 = vadd.xlane.f32.xlu0 %v214_v37 }
  0xc0   :  { %269 = vadd.xlane.f32.xlu0 %v268_v41 }
  0xc8   :  { %272 = vadd.xlane.f32.xlu0 %v271_v44 }
  0xdc   :  { %280 = vperm.xlu0 %500, %v275_v45  }
  0xe4   :  { %503 = vset.pattern.permute.xlu0 %v803_v53 }
 0x123   :  { %v213_v46 = vpop.xlane.xlu0 %212 }
 0x124   :  { %v230_v48 = vperm.slane %v213_v46, %v912_v31 }
 0x12b   :  { %v216_v47 = vpop.xlane.xlu0 %215 }
 0x12c   :  { %v231_v49 = vperm.slane %v216_v47, %v912_v31 }
 0x12e   :  { %v233_v50 = vsel %vm232_vm8, %v231_v49, %v230_v48 }
 0x12f   :  { %v235_v51 = vsel %vm225_vm9, -inf, %v233_v50 }
 0x130   :  { %v236_v52 = vsel %vm217_vm1, %v235_v51, -inf  ;;  %383 = vst.msk [vmem:[#allocation17] sm:$0x3] %vm217_vm1, %v235_v51 }
 0x131   :  { %237 = vmax.xlane.f32.xlu2 %v236_v52  ;;  %440 = dma.vmem_to_hbm [thread:$0]  %s436_s8, 32, %s438_s23, [#allocation18]  }
 0x133   :  { %v270_v54 = vpop.xlane.xlu0 %269 }
 0x13b   :  { %v273_v58 = vpop.xlane.xlu0 %272 }
 0x13c   :  { %v292_v3 = vmul.f32 %v288_v2, %v273_v58 }
 0x14e   :  { %v281_v60 = vpop.permute.xlu0 %280 }
 0x14f   :  { %v291_v62 = vmul.f32 %v281_v60, %v270_v54 }
 0x1a4   :  { %v238_v55 = vpop.xlane.xlu2 %237 }
 0x1a5   :  { %v239_v56 = vmax.f32 %v238_v55, 0.0 }
 0x1a7   :  { %v293_v57 = vsub.f32 0.0, %v239_v56  ;;  %v240_v5 = vsub.f32 %v235_v51, %v239_v56 }
 0x1a9   :  { %v294_v59 = vmul.f32 1.442695, %v293_v57  ;;  %v241_v7 = vmul.f32 1.442695, %v240_v5 }
 0x1ab   :  { %509 = vpow2.f32 %v294_v59 }
 0x1ac   :  { %511 = vpow2.f32 %v241_v7 }
 0x1b1   :  { %v510_v61 = vpop.eup %509 }
 0x1b2   :  { %v297_v63 = vperm.slane %v510_v61, 0  ;;  %v298_v1 = vperm.slane %v510_v61, 1  ;;  %v512_v11 = vpop.eup %511 }
 0x1b4   :  { %v301_v0 = vmul.f32 %v297_v63, %v291_v62  ;;  %v302_v4 = vmul.f32 %v298_v1, %v292_v3 }
 0x1b6   :  { %306 = vperm.xlu1 %501, %v301_v0  }
 0x1be   :  { %309 = vperm.xlu1 %501, %v302_v4  }
 0x1c6   :  { %387 = vperm.xlu1 %501, %v291_v62  }
 0x228   :  { %v307_v6 = vpop.permute.xlu1 %306 }
 0x229   :  { %v311_v9 = vperm.slane %v307_v6, %v912_v31 }
 0x230   :  { %v310_v8 = vpop.permute.xlu1 %309 }
 0x231   :  { %v312_v10 = vperm.slane %v310_v8, %v912_v31 }
 0x233   :  { %v313_v12 = vsel %vm232_vm8, %v312_v10, %v311_v9 }
 0x234   :  { %v315_v13 = vadd.f32 %v512_v11, %v313_v12 }
 0x236   :  { %v316_v14 = vsel %vm217_vm1, %v315_v13, 0.0  ;;  %513 = vlog2.f32 %v315_v13 }
 0x237   :  { %317 = vadd.xlane.f32.xlu2 %v316_v14 }
 0x238   :  { %v388_v19 = vpop.permute.xlu1 %387 }
 0x239   :  { %v392_v23 = vperm.slane %v388_v19, %v912_v31 }
 0x23c   :  { %v514_v15 = vpop.eup %513 }
 0x23d   :  { %v372_v16 = vmul.f32 0.6931472, %v514_v15 }
 0x23f   :  { %v373_v17 = vadd.f32 %v372_v16, %v239_v56 }
 0x241   :  { %382 = vst.msk [vmem:[#allocation16] sm:$0x3] %vm217_vm1, %v373_v17 }
 0x24f   :  { %390 = vperm.xlu2 %502, %v292_v3  }
 0x2aa   :  { %v318_v18 = vpop.xlane.xlu2 %317 }
 0x2ab   :  { %515 = vrcp.f32 %v318_v18 }
 0x2b1   :  { %v516_v20 = vpop.eup %515 }
 0x2b2   :  { %v320_v21 = vmul.f32 %v516_v20, %v318_v18  ;;  %v391_v22 = vpop.permute.xlu2 %390 }
 0x2b3   :  { %v393_v24 = vperm.slane %v391_v22, %v912_v31 }
 0x2b4   :  { %v321_v26 = vsub.f32 2.0, %v320_v21 }
 0x2b5   :  { %v394_v27 = vsel %vm232_vm8, %v393_v24, %v392_v23 }
 0x2b6   :  { %v322_v28 = vmul.f32 %v516_v20, %v321_v26  ;;  %396 = vst.msk [vmem:[#allocation19] sm:$0x3] %vm217_vm1, %v394_v27 }
 0x2b7   :  { %451 = dma.vmem_to_hbm [thread:$0]  %s447_s14, 32, %s449_s0, [#allocation18]  }
 0x2b8   :  { %v323_v29 = vmul.f32 %v322_v28, %v315_v13 }
 0x2ba   :  { %v324_v30 = vsel %vm221_vm7, %v323_v29, 0.0 }
 0x2bb   :  { %482 = vmatmul.msk.f32.vlgmr.msra.gmra.mxu2 %vm267_vm4, %v324_v30  ;;  %374 = vst.msk [vmem:[#allocation13] sm:$0x3] %vm217_vm1, %v324_v30  ;;  %v326_v32 = vrot.slane %v324_v30, 1 }
 0x2bc   :  { %407 = dma.vmem_to_hbm [thread:$0]  %s403_s27, 32, %s405_s4, [#allocation4]  }
 0x2bd   :  { %483 = vmatmul.msk.f32.vlgmr.msra.gmra.mxu3 %vm267_vm4, %v326_v32 }
 0x33e   :  { %v346_v33 = vpop.f32.mrf.mxu2 }
 0x340   :  { %v368_v25 = vpop.f32.mrf.mxu3 }
 0x341   :  { %v377_v31 = vrot.slane %v368_v25, 7 }
 0x343   :  { %v378_v34 = vsel %vm232_vm8, %v377_v31, %v346_v33 }
 0x344   :  { %381 = vst.msk [vmem:[#allocation14] sm:$0x3] %vm380_vm10, %v378_v34 }
 0x345   :  { %418 = dma.vmem_to_hbm [thread:$0]  %s414_s15, 32, %s416_s9, [#allocation15]  }
 0x346   :  { %429 = dma.vmem_to_hbm [thread:$0]  %s425_s18, 32, %s427_s3, [#allocation15]  }
 0x347   :  { %789 = dma.done.wait [#allocation4], 32  }
 0x348   :  { %790 = vsyncadd [#allocation4], 4294967264 }
 0x349   :  { %791 = dma.done.wait [#allocation15], 64  }
 0x34a   :  { %792 = vsyncadd [#allocation15], 4294967232 }
 0x34b   :  { %793 = dma.done.wait [#allocation18], 64  }
 0x34c   :  { %794 = vsyncadd [#allocation18], 4294967232 }
 0x34d   :  { %472 = vsyncpa [#allocation3], 1 }
 0x34e   :  { %473 = vsyncpa [#allocation6], 1 }
 0x34f   :  { %474 = vsyncpa [#allocation9], 1 }
 0x350   :  { %475 = vsyncpa [#allocation12], 1 }
 0x351   :  { %476 = vsyncpa [#allocation4], 1 }
 0x352   :  { %477 = vsyncpa [#allocation15], 1 }
 0x353   :  { %478 = vsyncpa [#allocation18], 1 }

</bundles_post_ra>
